<compile_context>
chip_gen: v6e
topology: v6e:2x2x1
jax: 0.10.0
libtpu: 0.0.40
codegen_flags: <defaults>
</compile_context>

<pallas_src>
import math

import jax
import jax.numpy as jnp
from jax.experimental import pallas as pl
from jax.experimental.pallas import tpu as pltpu


def _round_up(x: int, m: int) -> int:
    return ((x + m - 1) // m) * m


def _dma_gather_kernel(idx_ref, emb_hbm, out_ref, row_buf, copy_sems):
    """Gather TB embedding rows from the HBM table into one output tile.

    idx_ref:   (b_pad,) int32 in SMEM (scalar prefetch)
    emb_hbm:   (N, dims) embedding table, left in HBM (memory_space=pl.ANY)
    out_ref:   (TB, dims) VMEM output tile
    row_buf:   (TB, dims) VMEM scratch (DMA landing buffer)
    copy_sems: (TB,) DMA semaphores
    """
    tb = out_ref.shape[0]
    base = pl.program_id(0) * tb

    # Issue all TB row DMAs first (TB copies in flight), then wait on all of
    # them, then do one dense store into the pipelined output tile.
    copies = []
    for r in range(tb):
        row = idx_ref[base + r]  # SMEM scalar read (essentially free)
        cp = pltpu.make_async_copy(
            emb_hbm.at[row], row_buf.at[r], copy_sems.at[r]
        )
        cp.start()
        copies.append(cp)
    for cp in copies:
        cp.wait()

    out_ref[...] = row_buf[...]


def embedding_lookup(embeds: jax.Array, input_index: jax.Array,
                     *, block_b: int = 32) -> jax.Array:
    """Pallas equivalent of `Embeddings.forward`.

    embeds:      (num_embeddings, dims)
    input_index: integer tensor, e.g. (b, 1)
    returns:     input_index.shape + (dims,), i.e. (b, 1, dims) for (b, 1)
                 input, with out[i, 0, :] == embeds[input_index[i, 0], :]
    """
    num_embeddings, dims = embeds.shape
    idx_shape = tuple(input_index.shape)
    b = int(math.prod(idx_shape))
    itemsize = jnp.dtype(embeds.dtype).itemsize

    # Flatten and clamp.  NOTE: PyTorch would raise on out-of-range indices;
    # on TPU an OOB DMA address is unchecked/fatal, so we clamp instead.
    idx = jnp.clip(
        input_index.reshape(b).astype(jnp.int32), 0, num_embeddings - 1
    )

    # Rows gathered per grid step: multiple of 8 (sublane-dense output tile),
    # capped so the unrolled DMA issue loop stays small.
    tb = min(_round_up(block_b, 8), _round_up(b, 8))
    b_pad = _round_up(b, tb)
    if b_pad != b:
        idx = jnp.pad(idx, (0, b_pad - b))  # pad with index 0 (valid row)

    # True gather traffic: read + write of the requested rows, plus indices.
    cost = pl.CostEstimate(
        flops=0,
        transcendentals=0,
        bytes_accessed=2 * b_pad * dims * itemsize + b_pad * 4,
    )

    grid_spec = pltpu.PrefetchScalarGridSpec(
        num_scalar_prefetch=1,
        grid=(b_pad // tb,),
        in_specs=[
            # Embedding table stays in HBM; rows are DMA'd on demand.
            pl.BlockSpec(memory_space=pl.ANY),
        ],
        out_specs=pl.BlockSpec((tb, dims), lambda i, idx_ref: (i, 0)),
        scratch_shapes=[
            pltpu.VMEM((tb, dims), embeds.dtype),   # DMA landing buffer
            pltpu.SemaphoreType.DMA((tb,)),         # one sem per in-flight row
        ],
    )

    out_2d = pl.pallas_call(
        _dma_gather_kernel,
        grid_spec=grid_spec,
        out_shape=jax.ShapeDtypeStruct((b_pad, dims), embeds.dtype),
        compiler_params=pltpu.CompilerParams(
            dimension_semantics=("parallel",),
        ),
        cost_estimate=cost,
    )(idx, embeds)

    if b_pad != b:
        out_2d = out_2d[:b]
    # PyTorch fancy-indexing semantics: index shape + trailing (dims,).
    return out_2d.reshape(*idx_shape, dims)


if __name__ == "__main__":
    key = jax.random.PRNGKey(0)
    k_emb, k_idx = jax.random.split(key)

    num_embeddings = 16
    dims = 32
    batch = 8

    # Deterministic synthetic "ManifoldParameter" table (no checkpoint load).
    embeds = jax.random.normal(k_emb, (num_embeddings, dims), dtype=jnp.float32)
    # input_index: b x 1, as in the module docstring.
    input_index = jax.random.randint(
        k_idx, (batch, 1), minval=0, maxval=num_embeddings, dtype=jnp.int32
    )

    out = embedding_lookup(embeds, input_index)
    out = jax.block_until_ready(out)

    # Reference check against plain JAX fancy indexing (== PyTorch semantics).
    ref = embeds[input_index]                      # (b, 1, dims)
    assert out.shape == (batch, 1, dims), out.shape
    assert jnp.array_equal(out, ref), "mismatch vs reference gather"

    print("KERNEL_OK")
</pallas_src>

<mosaic_0001>
module attributes {stable_mosaic.version = 11 : i64} {
  func.func @_dma_gather_kernel(%arg0: i32, %arg1: memref<8xi32, #tpu.memory_space<smem>>, %arg2: memref<16x32xf32, #tpu.memory_space<any>>, %arg3: memref<8x32xf32, #tpu.memory_space<vmem>>, %arg4: memref<8x32xf32, #tpu.memory_space<vmem>>, %arg5: memref<8x!tpu.dma_semaphore, #tpu.memory_space<semaphore_mem>>) attributes {dimension_semantics = [#tpu.dimension_semantics<parallel>], iteration_bounds = array<i64: 1>, scalar_prefetch = 1 : i64, scratch_operands = 2 : i64, tpu.core_type = #tpu.core_type<tc>, window_params = [{}, {transform_indices = @transform_1, window_bounds = array<i64: 8, 32>}]} {
    %c8_i32 = arith.constant 8 : i32
    %0 = arith.muli %arg0, %c8_i32 : i32
    %c0_i32 = arith.constant 0 : i32
    %1 = arith.addi %0, %c0_i32 : i32
    %2 = arith.index_cast %1 : i32 to index
    %3 = memref.load %arg1[%2] : memref<8xi32, #tpu.memory_space<smem>>
    %c0_i32_0 = arith.constant 0 : i32
    %c0_i32_1 = arith.constant 0 : i32
    %c0_i32_2 = arith.constant 0 : i32
    %4 = tpu.memref_slice %arg2[%3, %c0_i32_2] : memref<16x32xf32, #tpu.memory_space<any>> -> memref<1x32xf32, #tpu.memory_space<any>>
    %5 = tpu.memref_squeeze %4 : memref<1x32xf32, #tpu.memory_space<any>> -> memref<32xf32, #tpu.memory_space<any>>
    %c0_i32_3 = arith.constant 0 : i32
    %6 = tpu.memref_slice %arg4[%c0_i32_0, %c0_i32_3] : memref<8x32xf32, #tpu.memory_space<vmem>> -> memref<1x32xf32, #tpu.memory_space<vmem>>
    %7 = tpu.memref_squeeze %6 : memref<1x32xf32, #tpu.memory_space<vmem>> -> memref<32xf32, #tpu.memory_space<vmem>>
    %8 = tpu.memref_slice %arg5[%c0_i32_1] : memref<8x!tpu.dma_semaphore, #tpu.memory_space<semaphore_mem>> -> memref<1x!tpu.dma_semaphore, #tpu.memory_space<semaphore_mem>>
    %9 = tpu.memref_squeeze %8 : memref<1x!tpu.dma_semaphore, #tpu.memory_space<semaphore_mem>> -> memref<!tpu.dma_semaphore, #tpu.memory_space<semaphore_mem>>
    tpu.enqueue_dma source(%5 : memref<32xf32, #tpu.memory_space<any>>) target(%7 : memref<32xf32, #tpu.memory_space<vmem>>) target_semaphore(%9 : memref<!tpu.dma_semaphore, #tpu.memory_space<semaphore_mem>>)
    %c1_i32 = arith.constant 1 : i32
    %10 = arith.addi %0, %c1_i32 : i32
    %11 = arith.index_cast %10 : i32 to index
    %12 = memref.load %arg1[%11] : memref<8xi32, #tpu.memory_space<smem>>
    %c1_i32_4 = arith.constant 1 : i32
    %c1_i32_5 = arith.constant 1 : i32
    %c0_i32_6 = arith.constant 0 : i32
    %13 = tpu.memref_slice %arg2[%12, %c0_i32_6] : memref<16x32xf32, #tpu.memory_space<any>> -> memref<1x32xf32, #tpu.memory_space<any>>
    %14 = tpu.memref_squeeze %13 : memref<1x32xf32, #tpu.memory_space<any>> -> memref<32xf32, #tpu.memory_space<any>>
    %c0_i32_7 = arith.constant 0 : i32
    %15 = tpu.memref_slice %arg4[%c1_i32_4, %c0_i32_7] : memref<8x32xf32, #tpu.memory_space<vmem>> -> memref<1x32xf32, #tpu.memory_space<vmem>>
    %16 = tpu.memref_squeeze %15 : memref<1x32xf32, #tpu.memory_space<vmem>> -> memref<32xf32, #tpu.memory_space<vmem>>
    %17 = tpu.memref_slice %arg5[%c1_i32_5] : memref<8x!tpu.dma_semaphore, #tpu.memory_space<semaphore_mem>> -> memref<1x!tpu.dma_semaphore, #tpu.memory_space<semaphore_mem>>
    %18 = tpu.memref_squeeze %17 : memref<1x!tpu.dma_semaphore, #tpu.memory_space<semaphore_mem>> -> memref<!tpu.dma_semaphore, #tpu.memory_space<semaphore_mem>>
    tpu.enqueue_dma source(%14 : memref<32xf32, #tpu.memory_space<any>>) target(%16 : memref<32xf32, #tpu.memory_space<vmem>>) target_semaphore(%18 : memref<!tpu.dma_semaphore, #tpu.memory_space<semaphore_mem>>)
    %c2_i32 = arith.constant 2 : i32
    %19 = arith.addi %0, %c2_i32 : i32
    %20 = arith.index_cast %19 : i32 to index
    %21 = memref.load %arg1[%20] : memref<8xi32, #tpu.memory_space<smem>>
    %c2_i32_8 = arith.constant 2 : i32
    %c2_i32_9 = arith.constant 2 : i32
    %c0_i32_10 = arith.constant 0 : i32
    %22 = tpu.memref_slice %arg2[%21, %c0_i32_10] : memref<16x32xf32, #tpu.memory_space<any>> -> memref<1x32xf32, #tpu.memory_space<any>>
    %23 = tpu.memref_squeeze %22 : memref<1x32xf32, #tpu.memory_space<any>> -> memref<32xf32, #tpu.memory_space<any>>
    %c0_i32_11 = arith.constant 0 : i32
    %24 = tpu.memref_slice %arg4[%c2_i32_8, %c0_i32_11] : memref<8x32xf32, #tpu.memory_space<vmem>> -> memref<1x32xf32, #tpu.memory_space<vmem>>
    %25 = tpu.memref_squeeze %24 : memref<1x32xf32, #tpu.memory_space<vmem>> -> memref<32xf32, #tpu.memory_space<vmem>>
    %26 = tpu.memref_slice %arg5[%c2_i32_9] : memref<8x!tpu.dma_semaphore, #tpu.memory_space<semaphore_mem>> -> memref<1x!tpu.dma_semaphore, #tpu.memory_space<semaphore_mem>>
    %27 = tpu.memref_squeeze %26 : memref<1x!tpu.dma_semaphore, #tpu.memory_space<semaphore_mem>> -> memref<!tpu.dma_semaphore, #tpu.memory_space<semaphore_mem>>
    tpu.enqueue_dma source(%23 : memref<32xf32, #tpu.memory_space<any>>) target(%25 : memref<32xf32, #tpu.memory_space<vmem>>) target_semaphore(%27 : memref<!tpu.dma_semaphore, #tpu.memory_space<semaphore_mem>>)
    %c3_i32 = arith.constant 3 : i32
    %28 = arith.addi %0, %c3_i32 : i32
    %29 = arith.index_cast %28 : i32 to index
    %30 = memref.load %arg1[%29] : memref<8xi32, #tpu.memory_space<smem>>
    %c3_i32_12 = arith.constant 3 : i32
    %c3_i32_13 = arith.constant 3 : i32
    %c0_i32_14 = arith.constant 0 : i32
    %31 = tpu.memref_slice %arg2[%30, %c0_i32_14] : memref<16x32xf32, #tpu.memory_space<any>> -> memref<1x32xf32, #tpu.memory_space<any>>
    %32 = tpu.memref_squeeze %31 : memref<1x32xf32, #tpu.memory_space<any>> -> memref<32xf32, #tpu.memory_space<any>>
    %c0_i32_15 = arith.constant 0 : i32
    %33 = tpu.memref_slice %arg4[%c3_i32_12, %c0_i32_15] : memref<8x32xf32, #tpu.memory_space<vmem>> -> memref<1x32xf32, #tpu.memory_space<vmem>>
    %34 = tpu.memref_squeeze %33 : memref<1x32xf32, #tpu.memory_space<vmem>> -> memref<32xf32, #tpu.memory_space<vmem>>
    %35 = tpu.memref_slice %arg5[%c3_i32_13] : memref<8x!tpu.dma_semaphore, #tpu.memory_space<semaphore_mem>> -> memref<1x!tpu.dma_semaphore, #tpu.memory_space<semaphore_mem>>
    %36 = tpu.memref_squeeze %35 : memref<1x!tpu.dma_semaphore, #tpu.memory_space<semaphore_mem>> -> memref<!tpu.dma_semaphore, #tpu.memory_space<semaphore_mem>>
    tpu.enqueue_dma source(%32 : memref<32xf32, #tpu.memory_space<any>>) target(%34 : memref<32xf32, #tpu.memory_space<vmem>>) target_semaphore(%36 : memref<!tpu.dma_semaphore, #tpu.memory_space<semaphore_mem>>)
    %c4_i32 = arith.constant 4 : i32
    %37 = arith.addi %0, %c4_i32 : i32
    %38 = arith.index_cast %37 : i32 to index
    %39 = memref.load %arg1[%38] : memref<8xi32, #tpu.memory_space<smem>>
    %c4_i32_16 = arith.constant 4 : i32
    %c4_i32_17 = arith.constant 4 : i32
    %c0_i32_18 = arith.constant 0 : i32
    %40 = tpu.memref_slice %arg2[%39, %c0_i32_18] : memref<16x32xf32, #tpu.memory_space<any>> -> memref<1x32xf32, #tpu.memory_space<any>>
    %41 = tpu.memref_squeeze %40 : memref<1x32xf32, #tpu.memory_space<any>> -> memref<32xf32, #tpu.memory_space<any>>
    %c0_i32_19 = arith.constant 0 : i32
    %42 = tpu.memref_slice %arg4[%c4_i32_16, %c0_i32_19] : memref<8x32xf32, #tpu.memory_space<vmem>> -> memref<1x32xf32, #tpu.memory_space<vmem>>
    %43 = tpu.memref_squeeze %42 : memref<1x32xf32, #tpu.memory_space<vmem>> -> memref<32xf32, #tpu.memory_space<vmem>>
    %44 = tpu.memref_slice %arg5[%c4_i32_17] : memref<8x!tpu.dma_semaphore, #tpu.memory_space<semaphore_mem>> -> memref<1x!tpu.dma_semaphore, #tpu.memory_space<semaphore_mem>>
    %45 = tpu.memref_squeeze %44 : memref<1x!tpu.dma_semaphore, #tpu.memory_space<semaphore_mem>> -> memref<!tpu.dma_semaphore, #tpu.memory_space<semaphore_mem>>
    tpu.enqueue_dma source(%41 : memref<32xf32, #tpu.memory_space<any>>) target(%43 : memref<32xf32, #tpu.memory_space<vmem>>) target_semaphore(%45 : memref<!tpu.dma_semaphore, #tpu.memory_space<semaphore_mem>>)
    %c5_i32 = arith.constant 5 : i32
    %46 = arith.addi %0, %c5_i32 : i32
    %47 = arith.index_cast %46 : i32 to index
    %48 = memref.load %arg1[%47] : memref<8xi32, #tpu.memory_space<smem>>
    %c5_i32_20 = arith.constant 5 : i32
    %c5_i32_21 = arith.constant 5 : i32
    %c0_i32_22 = arith.constant 0 : i32
    %49 = tpu.memref_slice %arg2[%48, %c0_i32_22] : memref<16x32xf32, #tpu.memory_space<any>> -> memref<1x32xf32, #tpu.memory_space<any>>
    %50 = tpu.memref_squeeze %49 : memref<1x32xf32, #tpu.memory_space<any>> -> memref<32xf32, #tpu.memory_space<any>>
    %c0_i32_23 = arith.constant 0 : i32
    %51 = tpu.memref_slice %arg4[%c5_i32_20, %c0_i32_23] : memref<8x32xf32, #tpu.memory_space<vmem>> -> memref<1x32xf32, #tpu.memory_space<vmem>>
    %52 = tpu.memref_squeeze %51 : memref<1x32xf32, #tpu.memory_space<vmem>> -> memref<32xf32, #tpu.memory_space<vmem>>
    %53 = tpu.memref_slice %arg5[%c5_i32_21] : memref<8x!tpu.dma_semaphore, #tpu.memory_space<semaphore_mem>> -> memref<1x!tpu.dma_semaphore, #tpu.memory_space<semaphore_mem>>
    %54 = tpu.memref_squeeze %53 : memref<1x!tpu.dma_semaphore, #tpu.memory_space<semaphore_mem>> -> memref<!tpu.dma_semaphore, #tpu.memory_space<semaphore_mem>>
    tpu.enqueue_dma source(%50 : memref<32xf32, #tpu.memory_space<any>>) target(%52 : memref<32xf32, #tpu.memory_space<vmem>>) target_semaphore(%54 : memref<!tpu.dma_semaphore, #tpu.memory_space<semaphore_mem>>)
    %c6_i32 = arith.constant 6 : i32
    %55 = arith.addi %0, %c6_i32 : i32
    %56 = arith.index_cast %55 : i32 to index
    %57 = memref.load %arg1[%56] : memref<8xi32, #tpu.memory_space<smem>>
    %c6_i32_24 = arith.constant 6 : i32
    %c6_i32_25 = arith.constant 6 : i32
    %c0_i32_26 = arith.constant 0 : i32
    %58 = tpu.memref_slice %arg2[%57, %c0_i32_26] : memref<16x32xf32, #tpu.memory_space<any>> -> memref<1x32xf32, #tpu.memory_space<any>>
    %59 = tpu.memref_squeeze %58 : memref<1x32xf32, #tpu.memory_space<any>> -> memref<32xf32, #tpu.memory_space<any>>
    %c0_i32_27 = arith.constant 0 : i32
    %60 = tpu.memref_slice %arg4[%c6_i32_24, %c0_i32_27] : memref<8x32xf32, #tpu.memory_space<vmem>> -> memref<1x32xf32, #tpu.memory_space<vmem>>
    %61 = tpu.memref_squeeze %60 : memref<1x32xf32, #tpu.memory_space<vmem>> -> memref<32xf32, #tpu.memory_space<vmem>>
    %62 = tpu.memref_slice %arg5[%c6_i32_25] : memref<8x!tpu.dma_semaphore, #tpu.memory_space<semaphore_mem>> -> memref<1x!tpu.dma_semaphore, #tpu.memory_space<semaphore_mem>>
    %63 = tpu.memref_squeeze %62 : memref<1x!tpu.dma_semaphore, #tpu.memory_space<semaphore_mem>> -> memref<!tpu.dma_semaphore, #tpu.memory_space<semaphore_mem>>
    tpu.enqueue_dma source(%59 : memref<32xf32, #tpu.memory_space<any>>) target(%61 : memref<32xf32, #tpu.memory_space<vmem>>) target_semaphore(%63 : memref<!tpu.dma_semaphore, #tpu.memory_space<semaphore_mem>>)
    %c7_i32 = arith.constant 7 : i32
    %64 = arith.addi %0, %c7_i32 : i32
    %65 = arith.index_cast %64 : i32 to index
    %66 = memref.load %arg1[%65] : memref<8xi32, #tpu.memory_space<smem>>
    %c7_i32_28 = arith.constant 7 : i32
    %c7_i32_29 = arith.constant 7 : i32
    %c0_i32_30 = arith.constant 0 : i32
    %67 = tpu.memref_slice %arg2[%66, %c0_i32_30] : memref<16x32xf32, #tpu.memory_space<any>> -> memref<1x32xf32, #tpu.memory_space<any>>
    %68 = tpu.memref_squeeze %67 : memref<1x32xf32, #tpu.memory_space<any>> -> memref<32xf32, #tpu.memory_space<any>>
    %c0_i32_31 = arith.constant 0 : i32
    %69 = tpu.memref_slice %arg4[%c7_i32_28, %c0_i32_31] : memref<8x32xf32, #tpu.memory_space<vmem>> -> memref<1x32xf32, #tpu.memory_space<vmem>>
    %70 = tpu.memref_squeeze %69 : memref<1x32xf32, #tpu.memory_space<vmem>> -> memref<32xf32, #tpu.memory_space<vmem>>
    %71 = tpu.memref_slice %arg5[%c7_i32_29] : memref<8x!tpu.dma_semaphore, #tpu.memory_space<semaphore_mem>> -> memref<1x!tpu.dma_semaphore, #tpu.memory_space<semaphore_mem>>
    %72 = tpu.memref_squeeze %71 : memref<1x!tpu.dma_semaphore, #tpu.memory_space<semaphore_mem>> -> memref<!tpu.dma_semaphore, #tpu.memory_space<semaphore_mem>>
    tpu.enqueue_dma source(%68 : memref<32xf32, #tpu.memory_space<any>>) target(%70 : memref<32xf32, #tpu.memory_space<vmem>>) target_semaphore(%72 : memref<!tpu.dma_semaphore, #tpu.memory_space<semaphore_mem>>)
    %c0_i32_32 = arith.constant 0 : i32
    %c0_i32_33 = arith.constant 0 : i32
    %c0_i32_34 = arith.constant 0 : i32
    %73 = tpu.memref_slice %arg2[%3, %c0_i32_34] : memref<16x32xf32, #tpu.memory_space<any>> -> memref<1x32xf32, #tpu.memory_space<any>>
    %74 = tpu.memref_squeeze %73 : memref<1x32xf32, #tpu.memory_space<any>> -> memref<32xf32, #tpu.memory_space<any>>
    %c0_i32_35 = arith.constant 0 : i32
    %75 = tpu.memref_slice %arg4[%c0_i32_32, %c0_i32_35] : memref<8x32xf32, #tpu.memory_space<vmem>> -> memref<1x32xf32, #tpu.memory_space<vmem>>
    %76 = tpu.memref_squeeze %75 : memref<1x32xf32, #tpu.memory_space<vmem>> -> memref<32xf32, #tpu.memory_space<vmem>>
    %77 = tpu.memref_slice %arg5[%c0_i32_33] : memref<8x!tpu.dma_semaphore, #tpu.memory_space<semaphore_mem>> -> memref<1x!tpu.dma_semaphore, #tpu.memory_space<semaphore_mem>>
    %78 = tpu.memref_squeeze %77 : memref<1x!tpu.dma_semaphore, #tpu.memory_space<semaphore_mem>> -> memref<!tpu.dma_semaphore, #tpu.memory_space<semaphore_mem>>
    tpu.wait_dma2 semaphore(%78 : memref<!tpu.dma_semaphore, #tpu.memory_space<semaphore_mem>>) src(%74 : memref<32xf32, #tpu.memory_space<any>>) dst(%76 : memref<32xf32, #tpu.memory_space<vmem>>)
    %c1_i32_36 = arith.constant 1 : i32
    %c1_i32_37 = arith.constant 1 : i32
    %c0_i32_38 = arith.constant 0 : i32
    %79 = tpu.memref_slice %arg2[%12, %c0_i32_38] : memref<16x32xf32, #tpu.memory_space<any>> -> memref<1x32xf32, #tpu.memory_space<any>>
    %80 = tpu.memref_squeeze %79 : memref<1x32xf32, #tpu.memory_space<any>> -> memref<32xf32, #tpu.memory_space<any>>
    %c0_i32_39 = arith.constant 0 : i32
    %81 = tpu.memref_slice %arg4[%c1_i32_36, %c0_i32_39] : memref<8x32xf32, #tpu.memory_space<vmem>> -> memref<1x32xf32, #tpu.memory_space<vmem>>
    %82 = tpu.memref_squeeze %81 : memref<1x32xf32, #tpu.memory_space<vmem>> -> memref<32xf32, #tpu.memory_space<vmem>>
    %83 = tpu.memref_slice %arg5[%c1_i32_37] : memref<8x!tpu.dma_semaphore, #tpu.memory_space<semaphore_mem>> -> memref<1x!tpu.dma_semaphore, #tpu.memory_space<semaphore_mem>>
    %84 = tpu.memref_squeeze %83 : memref<1x!tpu.dma_semaphore, #tpu.memory_space<semaphore_mem>> -> memref<!tpu.dma_semaphore, #tpu.memory_space<semaphore_mem>>
    tpu.wait_dma2 semaphore(%84 : memref<!tpu.dma_semaphore, #tpu.memory_space<semaphore_mem>>) src(%80 : memref<32xf32, #tpu.memory_space<any>>) dst(%82 : memref<32xf32, #tpu.memory_space<vmem>>)
    %c2_i32_40 = arith.constant 2 : i32
    %c2_i32_41 = arith.constant 2 : i32
    %c0_i32_42 = arith.constant 0 : i32
    %85 = tpu.memref_slice %arg2[%21, %c0_i32_42] : memref<16x32xf32, #tpu.memory_space<any>> -> memref<1x32xf32, #tpu.memory_space<any>>
    %86 = tpu.memref_squeeze %85 : memref<1x32xf32, #tpu.memory_space<any>> -> memref<32xf32, #tpu.memory_space<any>>
    %c0_i32_43 = arith.constant 0 : i32
    %87 = tpu.memref_slice %arg4[%c2_i32_40, %c0_i32_43] : memref<8x32xf32, #tpu.memory_space<vmem>> -> memref<1x32xf32, #tpu.memory_space<vmem>>
    %88 = tpu.memref_squeeze %87 : memref<1x32xf32, #tpu.memory_space<vmem>> -> memref<32xf32, #tpu.memory_space<vmem>>
    %89 = tpu.memref_slice %arg5[%c2_i32_41] : memref<8x!tpu.dma_semaphore, #tpu.memory_space<semaphore_mem>> -> memref<1x!tpu.dma_semaphore, #tpu.memory_space<semaphore_mem>>
    %90 = tpu.memref_squeeze %89 : memref<1x!tpu.dma_semaphore, #tpu.memory_space<semaphore_mem>> -> memref<!tpu.dma_semaphore, #tpu.memory_space<semaphore_mem>>
    tpu.wait_dma2 semaphore(%90 : memref<!tpu.dma_semaphore, #tpu.memory_space<semaphore_mem>>) src(%86 : memref<32xf32, #tpu.memory_space<any>>) dst(%88 : memref<32xf32, #tpu.memory_space<vmem>>)
    %c3_i32_44 = arith.constant 3 : i32
    %c3_i32_45 = arith.constant 3 : i32
    %c0_i32_46 = arith.constant 0 : i32
    %91 = tpu.memref_slice %arg2[%30, %c0_i32_46] : memref<16x32xf32, #tpu.memory_space<any>> -> memref<1x32xf32, #tpu.memory_space<any>>
    %92 = tpu.memref_squeeze %91 : memref<1x32xf32, #tpu.memory_space<any>> -> memref<32xf32, #tpu.memory_space<any>>
    %c0_i32_47 = arith.constant 0 : i32
    %93 = tpu.memref_slice %arg4[%c3_i32_44, %c0_i32_47] : memref<8x32xf32, #tpu.memory_space<vmem>> -> memref<1x32xf32, #tpu.memory_space<vmem>>
    %94 = tpu.memref_squeeze %93 : memref<1x32xf32, #tpu.memory_space<vmem>> -> memref<32xf32, #tpu.memory_space<vmem>>
    %95 = tpu.memref_slice %arg5[%c3_i32_45] : memref<8x!tpu.dma_semaphore, #tpu.memory_space<semaphore_mem>> -> memref<1x!tpu.dma_semaphore, #tpu.memory_space<semaphore_mem>>
    %96 = tpu.memref_squeeze %95 : memref<1x!tpu.dma_semaphore, #tpu.memory_space<semaphore_mem>> -> memref<!tpu.dma_semaphore, #tpu.memory_space<semaphore_mem>>
    tpu.wait_dma2 semaphore(%96 : memref<!tpu.dma_semaphore, #tpu.memory_space<semaphore_mem>>) src(%92 : memref<32xf32, #tpu.memory_space<any>>) dst(%94 : memref<32xf32, #tpu.memory_space<vmem>>)
    %c4_i32_48 = arith.constant 4 : i32
    %c4_i32_49 = arith.constant 4 : i32
    %c0_i32_50 = arith.constant 0 : i32
    %97 = tpu.memref_slice %arg2[%39, %c0_i32_50] : memref<16x32xf32, #tpu.memory_space<any>> -> memref<1x32xf32, #tpu.memory_space<any>>
    %98 = tpu.memref_squeeze %97 : memref<1x32xf32, #tpu.memory_space<any>> -> memref<32xf32, #tpu.memory_space<any>>
    %c0_i32_51 = arith.constant 0 : i32
    %99 = tpu.memref_slice %arg4[%c4_i32_48, %c0_i32_51] : memref<8x32xf32, #tpu.memory_space<vmem>> -> memref<1x32xf32, #tpu.memory_space<vmem>>
    %100 = tpu.memref_squeeze %99 : memref<1x32xf32, #tpu.memory_space<vmem>> -> memref<32xf32, #tpu.memory_space<vmem>>
    %101 = tpu.memref_slice %arg5[%c4_i32_49] : memref<8x!tpu.dma_semaphore, #tpu.memory_space<semaphore_mem>> -> memref<1x!tpu.dma_semaphore, #tpu.memory_space<semaphore_mem>>
    %102 = tpu.memref_squeeze %101 : memref<1x!tpu.dma_semaphore, #tpu.memory_space<semaphore_mem>> -> memref<!tpu.dma_semaphore, #tpu.memory_space<semaphore_mem>>
    tpu.wait_dma2 semaphore(%102 : memref<!tpu.dma_semaphore, #tpu.memory_space<semaphore_mem>>) src(%98 : memref<32xf32, #tpu.memory_space<any>>) dst(%100 : memref<32xf32, #tpu.memory_space<vmem>>)
    %c5_i32_52 = arith.constant 5 : i32
    %c5_i32_53 = arith.constant 5 : i32
    %c0_i32_54 = arith.constant 0 : i32
    %103 = tpu.memref_slice %arg2[%48, %c0_i32_54] : memref<16x32xf32, #tpu.memory_space<any>> -> memref<1x32xf32, #tpu.memory_space<any>>
    %104 = tpu.memref_squeeze %103 : memref<1x32xf32, #tpu.memory_space<any>> -> memref<32xf32, #tpu.memory_space<any>>
    %c0_i32_55 = arith.constant 0 : i32
    %105 = tpu.memref_slice %arg4[%c5_i32_52, %c0_i32_55] : memref<8x32xf32, #tpu.memory_space<vmem>> -> memref<1x32xf32, #tpu.memory_space<vmem>>
    %106 = tpu.memref_squeeze %105 : memref<1x32xf32, #tpu.memory_space<vmem>> -> memref<32xf32, #tpu.memory_space<vmem>>
    %107 = tpu.memref_slice %arg5[%c5_i32_53] : memref<8x!tpu.dma_semaphore, #tpu.memory_space<semaphore_mem>> -> memref<1x!tpu.dma_semaphore, #tpu.memory_space<semaphore_mem>>
    %108 = tpu.memref_squeeze %107 : memref<1x!tpu.dma_semaphore, #tpu.memory_space<semaphore_mem>> -> memref<!tpu.dma_semaphore, #tpu.memory_space<semaphore_mem>>
    tpu.wait_dma2 semaphore(%108 : memref<!tpu.dma_semaphore, #tpu.memory_space<semaphore_mem>>) src(%104 : memref<32xf32, #tpu.memory_space<any>>) dst(%106 : memref<32xf32, #tpu.memory_space<vmem>>)
    %c6_i32_56 = arith.constant 6 : i32
    %c6_i32_57 = arith.constant 6 : i32
    %c0_i32_58 = arith.constant 0 : i32
    %109 = tpu.memref_slice %arg2[%57, %c0_i32_58] : memref<16x32xf32, #tpu.memory_space<any>> -> memref<1x32xf32, #tpu.memory_space<any>>
    %110 = tpu.memref_squeeze %109 : memref<1x32xf32, #tpu.memory_space<any>> -> memref<32xf32, #tpu.memory_space<any>>
    %c0_i32_59 = arith.constant 0 : i32
    %111 = tpu.memref_slice %arg4[%c6_i32_56, %c0_i32_59] : memref<8x32xf32, #tpu.memory_space<vmem>> -> memref<1x32xf32, #tpu.memory_space<vmem>>
    %112 = tpu.memref_squeeze %111 : memref<1x32xf32, #tpu.memory_space<vmem>> -> memref<32xf32, #tpu.memory_space<vmem>>
    %113 = tpu.memref_slice %arg5[%c6_i32_57] : memref<8x!tpu.dma_semaphore, #tpu.memory_space<semaphore_mem>> -> memref<1x!tpu.dma_semaphore, #tpu.memory_space<semaphore_mem>>
    %114 = tpu.memref_squeeze %113 : memref<1x!tpu.dma_semaphore, #tpu.memory_space<semaphore_mem>> -> memref<!tpu.dma_semaphore, #tpu.memory_space<semaphore_mem>>
    tpu.wait_dma2 semaphore(%114 : memref<!tpu.dma_semaphore, #tpu.memory_space<semaphore_mem>>) src(%110 : memref<32xf32, #tpu.memory_space<any>>) dst(%112 : memref<32xf32, #tpu.memory_space<vmem>>)
    %c7_i32_60 = arith.constant 7 : i32
    %c7_i32_61 = arith.constant 7 : i32
    %c0_i32_62 = arith.constant 0 : i32
    %115 = tpu.memref_slice %arg2[%66, %c0_i32_62] : memref<16x32xf32, #tpu.memory_space<any>> -> memref<1x32xf32, #tpu.memory_space<any>>
    %116 = tpu.memref_squeeze %115 : memref<1x32xf32, #tpu.memory_space<any>> -> memref<32xf32, #tpu.memory_space<any>>
    %c0_i32_63 = arith.constant 0 : i32
    %117 = tpu.memref_slice %arg4[%c7_i32_60, %c0_i32_63] : memref<8x32xf32, #tpu.memory_space<vmem>> -> memref<1x32xf32, #tpu.memory_space<vmem>>
    %118 = tpu.memref_squeeze %117 : memref<1x32xf32, #tpu.memory_space<vmem>> -> memref<32xf32, #tpu.memory_space<vmem>>
    %119 = tpu.memref_slice %arg5[%c7_i32_61] : memref<8x!tpu.dma_semaphore, #tpu.memory_space<semaphore_mem>> -> memref<1x!tpu.dma_semaphore, #tpu.memory_space<semaphore_mem>>
    %120 = tpu.memref_squeeze %119 : memref<1x!tpu.dma_semaphore, #tpu.memory_space<semaphore_mem>> -> memref<!tpu.dma_semaphore, #tpu.memory_space<semaphore_mem>>
    tpu.wait_dma2 semaphore(%120 : memref<!tpu.dma_semaphore, #tpu.memory_space<semaphore_mem>>) src(%116 : memref<32xf32, #tpu.memory_space<any>>) dst(%118 : memref<32xf32, #tpu.memory_space<vmem>>)
    %c0 = arith.constant 0 : index
    %c0_64 = arith.constant 0 : index
    %121 = vector.load %arg4[%c0, %c0_64] : memref<8x32xf32, #tpu.memory_space<vmem>>, vector<8x32xf32>
    %c0_65 = arith.constant 0 : index
    %c0_66 = arith.constant 0 : index
    %122 = vector.load %arg3[%c0_65, %c0_66] : memref<8x32xf32, #tpu.memory_space<vmem>>, vector<8x32xf32>
    tpu.vector_store %arg3[%c0_65, %c0_66], %121 {strides = array<i32>} : memref<8x32xf32, #tpu.memory_space<vmem>>, vector<8x32xf32>,
    return
  }
  func.func @transform_1(%arg0: i32, %arg1: memref<8xi32, #tpu.memory_space<smem>>) -> (i32, i32) {
    %c0_i32 = arith.constant 0 : i32
    %c0_i32_0 = arith.constant 0 : i32
    return %arg0, %c0_i32 : i32, i32
  }
}

</mosaic_0001>

<bundles_post_ra>
// kernel: tpu_custom_call.1
= control target key start
LH: loop header
LB: loop body
LE: loop exit
PB: predicated region body
PF: predicated region fallthrough
CT: control target
= control target key end

     0   :  { %s507_s9 = smov [#allocation5]   ;;  %s660_s0 = inlined_call_operand.hbm [shape: s32[8], index: 0, kind: input, shape index: {}]   ;;  %s661_s1 = inlined_call_operand.hbm [shape: f32[16,32], index: 1, kind: input, shape index: {}]   ;;  %s662_s2 = inlined_call_operand.hbm [shape: f32[8,32], index: 2, kind: output, shape index: {}]  }
   0x1   :  { %8 = dma.hbm_to_smem %s660_s0, 16, %s507_s9, [#allocation4] }
   0x2   :  { %487 = dma.done.wait [#allocation4], 16 }
   0x3   :  { %488 = vsyncadd [#allocation4], 4294967280 }
   0x4   :  { %10 = sfence }
   0x5   :  { %11 = vsyncpa [#allocation7], 0  ;;  %s13_s12 = sld [smem:[#allocation5]]  ;;  %s508_s13 = smov [#allocation2]  }
   0x6   :  { %s23_s14 = sshll.u32 %s508_s13, 4  ;;  %s535_s15 = sld [smem:[#allocation5 + $0x1]]  ;;  %s537_s14 = int_to_ptr.vmem [resolvable:$true] %s23_s14 }
   0x7   :  { %s509_s16 = smov [#allocation2 + $0x1]   ;;  %s539_s18 = sld [smem:[#allocation5 + $0x2]] }
   0x8   :  { %s40_s17 = sshll.u32 %s509_s16, 4  ;;  %s510_s19 = smov [#allocation2 + $0x2]   ;;  %s541_s17 = int_to_ptr.vmem [resolvable:$true] %s40_s17 }
   0x9   :  { %s57_s0 = sshll.u32 %s510_s19, 4  ;;  %s543_s20 = sld [smem:[#allocation5 + $0x3]]  ;;  %s545_s0 = int_to_ptr.vmem [resolvable:$true] %s57_s0 }
   0xa   :  { %s554_s29 = scalar_lea.hbm %s661_s1, 256 }
   0xb   :  { %s250_s21 = sshll.u32 %s13_s12, 4 }
   0xc   :  { %s15_s24 = scalar_lea.hbm %s661_s1, %s250_s21  ;;  %s252_s25 = sshll.u32 %s535_s15, 4 }
   0xd   :  { %s291_s26 = scalar_lea.hbm %s15_s24, 16  ;;  %p294_p1 = scmp.lt.s32.totalorder %s15_s24, %s661_s1 }
   0xe   :  { %p292_p0 = scmp.ne.s32.totalorder %s15_s24, %s291_s26  ;;  %p295_p2 = scmp.lt.s32.totalorder %s554_s29, %s291_s26 }
  0x10   :  { %p296_p3 = por %p295_p2, %p294_p1 }
  0x12   :  { %p297_p4 = pnand %p296_p3, %p292_p0 }
  0x14   :  { %300 = shalt.err (!%p297_p4)  }
  0x15   :  { %s301_s4 = scalar_lea.vmem %s537_s14, 16  ;;  %s563_s5 = scalar_lea.vmem %s537_s14, 128 }
  0x16   :  { %p302_p5 = scmp.ne.s32.totalorder %s537_s14, %s301_s4  ;;  %p306_p6 = scmp.lt.s32.totalorder %s537_s14, %s537_s14 }
  0x17   :  { %p307_p7 = scmp.lt.s32.totalorder %s563_s5, %s301_s4 }
  0x19   :  { %p308_p8 = por %p307_p7, %p306_p6 }
  0x1b   :  { %p309_p9 = pnand %p308_p8, %p302_p5 }
  0x1d   :  { %312 = shalt.err (!%p309_p9)  }
  0x1e   :  { %26 = dma.hbm_to_vmem [thread:$0]  %s15_s24, 16, %s537_s14, [#allocation3] }
  0x1f   :  { %s30_s8 = scalar_lea.hbm %s661_s1, %s252_s25  ;;  %s254_s9 = sshll.u32 %s539_s18, 4 }
  0x20   :  { %s313_s10 = scalar_lea.hbm %s30_s8, 16  ;;  %p316_p11 = scmp.lt.s32.totalorder %s30_s8, %s661_s1 }
  0x21   :  { %p314_p10 = scmp.ne.s32.totalorder %s30_s8, %s313_s10  ;;  %p317_p12 = scmp.lt.s32.totalorder %s554_s29, %s313_s10 }
  0x23   :  { %p318_p13 = por %p317_p12, %p316_p11 }
  0x25   :  { %p319_p0 = pnand %p318_p13, %p314_p10 }
  0x27   :  { %322 = shalt.err (!%p319_p0)  }
  0x28   :  { %s323_s13 = scalar_lea.vmem %s541_s17, 16  ;;  %p328_p2 = scmp.lt.s32.totalorder %s541_s17, %s537_s14 }
  0x29   :  { %p324_p1 = scmp.ne.s32.totalorder %s541_s17, %s323_s13  ;;  %p329_p3 = scmp.lt.s32.totalorder %s563_s5, %s323_s13 }
  0x2b   :  { %p330_p4 = por %p329_p3, %p328_p2 }
  0x2d   :  { %p331_p5 = pnand %p330_p4, %p324_p1 }
  0x2f   :  { %334 = shalt.err (!%p331_p5)  }
  0x30   :  { %43 = dma.hbm_to_vmem [thread:$0]  %s30_s8, 16, %s541_s17, [#allocation3 + $0x1] }
  0x31   :  { %s47_s18 = scalar_lea.hbm %s661_s1, %s254_s9  ;;  %s256_s19 = sshll.u32 %s543_s20, 4 }
  0x32   :  { %s335_s21 = scalar_lea.hbm %s47_s18, 16  ;;  %p338_p7 = scmp.lt.s32.totalorder %s47_s18, %s661_s1 }
  0x33   :  { %p336_p6 = scmp.ne.s32.totalorder %s47_s18, %s335_s21  ;;  %p339_p8 = scmp.lt.s32.totalorder %s554_s29, %s335_s21 }
  0x35   :  { %p340_p9 = por %p339_p8, %p338_p7 }
  0x37   :  { %p341_p10 = pnand %p340_p9, %p336_p6 }
  0x39   :  { %344 = shalt.err (!%p341_p10)  }
  0x3a   :  { %s345_s17 = scalar_lea.vmem %s545_s0, 16  ;;  %p350_p12 = scmp.lt.s32.totalorder %s545_s0, %s537_s14 }
  0x3b   :  { %p346_p11 = scmp.ne.s32.totalorder %s545_s0, %s345_s17  ;;  %p351_p13 = scmp.lt.s32.totalorder %s563_s5, %s345_s17 }
  0x3d   :  { %p352_p0 = por %p351_p13, %p350_p12 }
  0x3f   :  { %p353_p1 = pnand %p352_p0, %p346_p11 }
  0x41   :  { %356 = shalt.err (!%p353_p1)  }
  0x42   :  { %60 = dma.hbm_to_vmem [thread:$0]  %s47_s18, 16, %s545_s0, [#allocation3 + $0x2] }
  0x43   :  { %s64_s25 = scalar_lea.hbm %s661_s1, %s256_s19  ;;  %s511_s26 = smov [#allocation2 + $0x3]  }
  0x44   :  { %s74_s27 = sshll.u32 %s511_s26, 4  ;;  %s257_s28 = sld [smem:[#allocation5 + $0x4]]  ;;  %s75_s27 = int_to_ptr.vmem [resolvable:$true] %s74_s27 }
  0x45   :  { %s357_s30 = scalar_lea.hbm %s64_s25, 16  ;;  %p360_p3 = scmp.lt.s32.totalorder %s64_s25, %s661_s1 }
  0x46   :  { %p358_p2 = scmp.ne.s32.totalorder %s64_s25, %s357_s30  ;;  %p361_p4 = scmp.lt.s32.totalorder %s554_s29, %s357_s30 }
  0x48   :  { %p362_p5 = por %p361_p4, %p360_p3 }
  0x4a   :  { %p363_p6 = pnand %p362_p5, %p358_p2 }
  0x4c   :  { %366 = shalt.err (!%p363_p6)  }
  0x4d   :  { %s367_s6 = scalar_lea.vmem %s75_s27, 16  ;;  %p372_p8 = scmp.lt.s32.totalorder %s75_s27, %s537_s14 }
  0x4e   :  { %p368_p7 = scmp.ne.s32.totalorder %s75_s27, %s367_s6  ;;  %p373_p9 = scmp.lt.s32.totalorder %s563_s5, %s367_s6 }
  0x50   :  { %p374_p10 = por %p373_p9, %p372_p8 }
  0x52   :  { %p375_p11 = pnand %p374_p10, %p368_p7 }
  0x54   :  { %378 = shalt.err (!%p375_p11)  }
  0x55   :  { %77 = dma.hbm_to_vmem [thread:$0]  %s64_s25, 16, %s75_s27, [#allocation3 + $0x3] }
  0x56   :  { %s512_s0 = smov [#allocation2 + $0x4]   ;;  %s259_s8 = sld [smem:[#allocation5 + $0x5]] }
  0x57   :  { %s91_s7 = sshll.u32 %s512_s0, 4  ;;  %s513_s9 = smov [#allocation2 + $0x5]   ;;  %s92_s7 = int_to_ptr.vmem [resolvable:$true] %s91_s7 }
  0x58   :  { %s108_s10 = sshll.u32 %s513_s9, 4  ;;  %s606_s11 = sld [smem:[#allocation5 + $0x6]]  ;;  %s608_s10 = int_to_ptr.vmem [resolvable:$true] %s108_s10 }
  0x59   :  { %s258_s12 = sshll.u32 %s257_s28, 4 }
  0x5a   :  { %s81_s16 = scalar_lea.hbm %s661_s1, %s258_s12 }
  0x5b   :  { %s379_s18 = scalar_lea.hbm %s81_s16, 16  ;;  %p382_p13 = scmp.lt.s32.totalorder %s81_s16, %s661_s1 }
  0x5c   :  { %p380_p12 = scmp.ne.s32.totalorder %s81_s16, %s379_s18  ;;  %p383_p0 = scmp.lt.s32.totalorder %s554_s29, %s379_s18 }
  0x5e   :  { %p384_p1 = por %p383_p0, %p382_p13 }
  0x60   :  { %p385_p2 = pnand %p384_p1, %p380_p12 }
  0x62   :  { %388 = shalt.err (!%p385_p2)  }
  0x63   :  { %s389_s22 = scalar_lea.vmem %s92_s7, 16  ;;  %p394_p4 = scmp.lt.s32.totalorder %s92_s7, %s537_s14 }
  0x64   :  { %p390_p3 = scmp.ne.s32.totalorder %s92_s7, %s389_s22  ;;  %p395_p5 = scmp.lt.s32.totalorder %s563_s5, %s389_s22 }
  0x66   :  { %p396_p6 = por %p395_p5, %p394_p4 }
  0x68   :  { %p397_p7 = pnand %p396_p6, %p390_p3 }
  0x6a   :  { %400 = shalt.err (!%p397_p7)  }
  0x6b   :  { %94 = dma.hbm_to_vmem [thread:$0]  %s81_s16, 16, %s92_s7, [#allocation3 + $0x4] }
  0x6c   :  { %s260_s23 = sshll.u32 %s259_s8, 4  ;;  %s514_s17 = smov [#allocation2 + $0x6]  }
  0x6d   :  { %s125_s20 = sshll.u32 %s514_s17, 4  ;;  %s98_s26 = scalar_lea.hbm %s661_s1, %s260_s23  ;;  %s622_s20 = int_to_ptr.vmem [resolvable:$true] %s125_s20 }
  0x6e   :  { %s401_s27 = scalar_lea.hbm %s98_s26, 16  ;;  %p404_p9 = scmp.lt.s32.totalorder %s98_s26, %s661_s1 }
  0x6f   :  { %p402_p8 = scmp.ne.s32.totalorder %s98_s26, %s401_s27  ;;  %p405_p10 = scmp.lt.s32.totalorder %s554_s29, %s401_s27 }
  0x71   :  { %p406_p11 = por %p405_p10, %p404_p9 }
  0x73   :  { %p407_p12 = pnand %p406_p11, %p402_p8 }
  0x75   :  { %410 = shalt.err (!%p407_p12)  }
  0x76   :  { %s411_s3 = scalar_lea.vmem %s608_s10, 16  ;;  %p416_p0 = scmp.lt.s32.totalorder %s608_s10, %s537_s14 }
  0x77   :  { %p412_p13 = scmp.ne.s32.totalorder %s608_s10, %s411_s3  ;;  %p417_p1 = scmp.lt.s32.totalorder %s563_s5, %s411_s3 }
  0x79   :  { %p418_p2 = por %p417_p1, %p416_p0 }
  0x7b   :  { %p419_p3 = pnand %p418_p2, %p412_p13 }
  0x7d   :  { %422 = shalt.err (!%p419_p3)  }
  0x7e   :  { %111 = dma.hbm_to_vmem [thread:$0]  %s98_s26, 16, %s608_s10, [#allocation3 + $0x5] }
  0x7f   :  { %s262_s4 = sshll.u32 %s606_s11, 4  ;;  %s263_s6 = sld [smem:[#allocation5 + $0x7]] }
  0x80   :  { %s115_s8 = scalar_lea.hbm %s661_s1, %s262_s4 }
  0x81   :  { %s423_s9 = scalar_lea.hbm %s115_s8, 16  ;;  %p426_p5 = scmp.lt.s32.totalorder %s115_s8, %s661_s1 }
  0x82   :  { %p424_p4 = scmp.ne.s32.totalorder %s115_s8, %s423_s9  ;;  %p427_p6 = scmp.lt.s32.totalorder %s554_s29, %s423_s9 }
  0x84   :  { %p428_p7 = por %p427_p6, %p426_p5 }
  0x86   :  { %p429_p8 = pnand %p428_p7, %p424_p4 }
  0x88   :  { %432 = shalt.err (!%p429_p8)  }
  0x89   :  { %s433_s10 = scalar_lea.vmem %s622_s20, 16  ;;  %p438_p10 = scmp.lt.s32.totalorder %s622_s20, %s537_s14 }
  0x8a   :  { %p434_p9 = scmp.ne.s32.totalorder %s622_s20, %s433_s10  ;;  %p439_p11 = scmp.lt.s32.totalorder %s563_s5, %s433_s10 }
  0x8c   :  { %p440_p12 = por %p439_p11, %p438_p10 }
  0x8e   :  { %p441_p13 = pnand %p440_p12, %p434_p9 }
  0x90   :  { %444 = shalt.err (!%p441_p13)  }
  0x91   :  { %128 = dma.hbm_to_vmem [thread:$0]  %s115_s8, 16, %s622_s20, [#allocation3 + $0x6] }
  0x92   :  { %s515_s11 = smov [#allocation2 + $0x7]   ;;  %s264_s16 = sshll.u32 %s263_s6, 4 }
  0x93   :  { %s142_s15 = sshll.u32 %s515_s11, 4  ;;  %s132_s21 = scalar_lea.hbm %s661_s1, %s264_s16  ;;  %s143_s15 = int_to_ptr.vmem [resolvable:$true] %s142_s15 }
  0x94   :  { %s445_s22 = scalar_lea.hbm %s132_s21, 16  ;;  %p448_p1 = scmp.lt.s32.totalorder %s132_s21, %s661_s1 }
  0x95   :  { %p446_p0 = scmp.ne.s32.totalorder %s132_s21, %s445_s22  ;;  %p449_p2 = scmp.lt.s32.totalorder %s554_s29, %s445_s22 }
  0x97   :  { %p450_p3 = por %p449_p2, %p448_p1 }
  0x99   :  { %p451_p4 = pnand %p450_p3, %p446_p0 }
  0x9b   :  { %454 = shalt.err (!%p451_p4)  }
  0x9c   :  { %s455_s24 = scalar_lea.vmem %s143_s15, 16  ;;  %p460_p6 = scmp.lt.s32.totalorder %s143_s15, %s537_s14 }
  0x9d   :  { %p456_p5 = scmp.ne.s32.totalorder %s143_s15, %s455_s24  ;;  %p461_p7 = scmp.lt.s32.totalorder %s563_s5, %s455_s24 }
  0x9f   :  { %p462_p8 = por %p461_p7, %p460_p6 }
  0xa1   :  { %p463_p9 = pnand %p462_p8, %p456_p5 }
  0xa3   :  { %466 = shalt.err (!%p463_p9)  }
  0xa4   :  { %145 = dma.hbm_to_vmem [thread:$0]  %s132_s21, 16, %s143_s15, [#allocation3 + $0x7] }
  0xa5   :  { %489 = dma.done.wait [#allocation3], 16 }
  0xa6   :  { %490 = vsyncadd [#allocation3], 4294967280 }
  0xa7   :  { %491 = dma.done.wait [#allocation3 + $0x1], 16 }
  0xa8   :  { %492 = vsyncadd [#allocation3 + $0x1], 4294967280 }
  0xa9   :  { %493 = dma.done.wait [#allocation3 + $0x2], 16 }
  0xaa   :  { %494 = vsyncadd [#allocation3 + $0x2], 4294967280 }
  0xab   :  { %495 = dma.done.wait [#allocation3 + $0x3], 16 }
  0xac   :  { %496 = vsyncadd [#allocation3 + $0x3], 4294967280 }
  0xad   :  { %497 = dma.done.wait [#allocation3 + $0x4], 16 }
  0xae   :  { %498 = vsyncadd [#allocation3 + $0x4], 4294967280 }
  0xaf   :  { %499 = dma.done.wait [#allocation3 + $0x5], 16 }
  0xb0   :  { %500 = vsyncadd [#allocation3 + $0x5], 4294967280 }
  0xb1   :  { %501 = dma.done.wait [#allocation3 + $0x6], 16 }
  0xb2   :  { %502 = vsyncadd [#allocation3 + $0x6], 4294967280 }
  0xb3   :  { %503 = dma.done.wait [#allocation3 + $0x7], 16 }
  0xb4   :  { %504 = vsyncadd [#allocation3 + $0x7], 4294967280  ;;  %s516_s1 = smov [#allocation6]   ;;  %vm163_vm0 = vcmask 261120   ;;  %v162_v0 = vld [vmem:[#allocation2] sm:$0xff] }
  0xb5   :  { %s171_s14 = sshll.u32 %s516_s1, 4  ;;  %164 = vst.msk [vmem:[#allocation6] sm:$0xff] %vm163_vm0, %v162_v0  ;;  %s172_s14 = int_to_ptr.vmem [resolvable:$true] %s171_s14 }
  0xb6   :  { %s467_s29 = scalar_lea.vmem %s172_s14, 128  ;;  %p472_p11 = scmp.lt.s32.totalorder %s172_s14, %s172_s14 }
  0xb7   :  { %p468_p10 = scmp.ne.s32.totalorder %s172_s14, %s467_s29  ;;  %p473_p12 = scmp.lt.s32.totalorder %s467_s29, %s467_s29 }
  0xb9   :  { %p474_p13 = por %p473_p12, %p472_p11 }
  0xbb   :  { %p475_p0 = pnand %p474_p13, %p468_p10 }
  0xbd   :  { %478 = shalt.err (!%p475_p0)
}
  0xbe   :  { %174 = dma.vmem_to_hbm [thread:$0]  %s172_s14, 128, %s662_s2, [#allocation7]  }
  0xbf   :  { %505 = dma.done.wait [#allocation7], 128  }
  0xc0   :  { %506 = vsyncadd [#allocation7], 4294967168 }
  0xc1   :  { %178 = vsyncpa [#allocation7], 1 }
  0xc2   :  { %179 = vsyncmov [#allocation3] }
  0xc5   :  { %s180_s25 = vpop.sfrf %179 }
  0xc6   :  { %p265_p1 = scmp.ne.s32.totalorder %s180_s25, 0 }
  0xc8   :  { %184 = shalt.err (%p265_p1)  }
  0xc9   :  { %186 = vsyncmov [#allocation3 + $0x1] }
  0xcc   :  { %s187_s26 = vpop.sfrf %186 }
  0xcd   :  { %p266_p2 = scmp.ne.s32.totalorder %s187_s26, 0 }
  0xcf   :  { %191 = shalt.err (%p266_p2)  }
  0xd0   :  { %193 = vsyncmov [#allocation3 + $0x2] }
  0xd3   :  { %s194_s27 = vpop.sfrf %193 }
  0xd4   :  { %p267_p3 = scmp.ne.s32.totalorder %s194_s27, 0 }
  0xd6   :  { %198 = shalt.err (%p267_p3)  }
  0xd7   :  { %200 = vsyncmov [#allocation3 + $0x3] }
  0xda   :  { %s201_s28 = vpop.sfrf %200 }
  0xdb   :  { %p268_p4 = scmp.ne.s32.totalorder %s201_s28, 0 }
  0xdd   :  { %205 = shalt.err (%p268_p4)  }
  0xde   :  { %207 = vsyncmov [#allocation3 + $0x4] }
  0xe1   :  { %s208_s2 = vpop.sfrf %207 }
  0xe2   :  { %p269_p5 = scmp.ne.s32.totalorder %s208_s2, 0 }
  0xe4   :  { %212 = shalt.err (%p269_p5)  }
  0xe5   :  { %214 = vsyncmov [#allocation3 + $0x5] }
  0xe8   :  { %s215_s30 = vpop.sfrf %214 }
  0xe9   :  { %p270_p6 = scmp.ne.s32.totalorder %s215_s30, 0 }
  0xeb   :  { %219 = shalt.err (%p270_p6)  }
  0xec   :  { %221 = vsyncmov [#allocation3 + $0x6] }
  0xef   :  { %s222_s3 = vpop.sfrf %221 }
  0xf0   :  { %p271_p7 = scmp.ne.s32.totalorder %s222_s3, 0 }
  0xf2   :  { %226 = shalt.err (%p271_p7)  }
  0xf3   :  { %228 = vsyncmov [#allocation3 + $0x7] }
  0xf6   :  { %s229_s4 = vpop.sfrf %228 }
  0xf7   :  { %p272_p8 = scmp.ne.s32.totalorder %s229_s4, 0 }
  0xf9   :  { %233 = shalt.err (%p272_p8)  }

</bundles_post_ra>
